<compile_context>
chip_gen: v7x
topology: tpu7x:2x2x1
jax: 0.10.0
libtpu: 0.0.40
codegen_flags: <defaults>
</compile_context>

<pallas_src>
import functools
import math

import numpy as np
import jax
import jax.numpy as jnp
from jax.experimental import pallas as pl
from jax.experimental.pallas import tpu as pltpu


# ---------------------------------------------------------------------------
# Host-side filter construction (mirrors upfirdn2d.setup_filter semantics)
# ---------------------------------------------------------------------------
def _effective_taps(resampling_filter):
    """Normalized + flipped 1-D taps (upfirdn2d flips before cross-corr)."""
    f = np.asarray(resampling_filter, np.float64)
    f = f / f.sum()
    return f[::-1].copy()


def _resampling_matrix(n, taps, down, pad0, pad1):
    """Matrix M (n_out, n): out[i] = sum_a taps[a] * x[down*i + a - pad0]."""
    fw = len(taps)
    n_out = (n + pad0 + pad1 - fw) // down + 1
    M = np.zeros((n_out, n), np.float64)
    for i in range(n_out):
        for a in range(fw):
            m = down * i + a - pad0
            if 0 <= m < n:
                M[i, m] += taps[a]
    return M


def _tpu_vmem_and_cores():
    """Best-effort physical VMEM bytes and TensorCore count (safe defaults)."""
    vmem = 64 * 1024 * 1024          # conservative default (v7x per-TC VMEM)
    cores = 1
    try:
        info = pltpu.get_tpu_info()
        vmem = int(getattr(info, "vmem_capacity_bytes", vmem) or vmem)
        for name in ("num_cores", "core_count", "num_tensorcores"):
            v = getattr(info, name, None)
            if v:
                cores = int(v)
                break
    except Exception:
        pass
    return vmem, cores


def _pick_channel_tile(C, per_c_bytes, budget_bytes, *, group, sub_in,
                       out_num, out_den, C_out, sub_out, min_steps, n_batch):
    """Largest channel tile dividing C that satisfies group alignment, the
    BlockSpec second-minor rules (for in/out/gain blocks), the VMEM budget,
    and (if possible) keeps at least `min_steps` total grid steps."""
    def ok(t):
        if C % t or t % group or (t * out_num) % out_den:
            return False
        ot = (t * out_num) // out_den
        if t % sub_in and t != C:
            return False
        if ot % sub_out and ot != C_out:
            return False
        return True

    valid = [t for t in range(group, C + 1, group) if ok(t)]
    if not valid:                     # t == C is always legal; defensive only
        valid = [C]
    fitting = [t for t in valid if t * per_c_bytes <= budget_bytes]
    pool = fitting if fitting else [min(valid)]
    best = max(pool)
    if min_steps > 1 and n_batch * (C // best) < min_steps:
        alt = [t for t in pool if n_batch * (C // t) >= min_steps]
        if alt:                       # keep both TensorCores busy (v7x)
            best = max(alt)
    return best


# ---------------------------------------------------------------------------
# Pallas kernels
# ---------------------------------------------------------------------------
def _kron_fast_kernel(x_ref, g_ref, k_ref, o_ref):
    """Fast path (C_in == C_out), Kronecker plan.

    x block (Ct, H*W), K (H*W, Ho*Wo): ONE MXU matmul, gain folded into the
    f32 result, ONE lane-dense store."""
    x = x_ref[...].astype(k_ref.dtype)
    y = jnp.dot(x, k_ref[...], preferred_element_type=jnp.float32)
    y = y * g_ref[...]                       # (Ct,1) f32 broadcast (hoisted)
    o_ref[...] = y.astype(o_ref.dtype)


def _kron_slow_kernel(x_ref, g_ref, k_ref, o_ref, *, nq, rsum, inv_rr):
    """Slow path (C_in != C_out), Kronecker plan.

    K columns hold `nq` blocks, each the sum of gcd(rr,4) pixel-unshuffle
    phases; the remaining grouped-mean reduction (over `rsum` consecutive
    z-channels) is a free leading-dim reshape + sum."""
    ct = x_ref.shape[0]
    hw_o = o_ref.shape[-1]
    x = x_ref[...].astype(k_ref.dtype)
    y = jnp.dot(x, k_ref[...], preferred_element_type=jnp.float32)  # (Ct,nq*HoWo)
    y = y * (g_ref[...] * inv_rr)            # per-input-channel gain / rr, f32
    if nq > 1:
        y = y.reshape(ct * nq, hw_o)
    if rsum > 1:
        y = y.reshape((ct * nq) // rsum, rsum, hw_o).sum(axis=1)
    o_ref[...] = y.astype(o_ref.dtype)


def _sep_fast_kernel(x_ref, g_ref, dh_ref, dwT_ref, o_ref):
    """Fast path, separable plan (large maps): flattened W contraction, one
    batched H contraction (channel batch), one store."""
    ct, H, W = x_ref.shape
    mxu = dwT_ref.dtype
    Wo = dwT_ref.shape[1]
    x = x_ref[...].reshape(ct * H, W).astype(mxu)
    t = jnp.dot(x, dwT_ref[...], preferred_element_type=jnp.float32)  # (Ct*H,Wo)
    t = t.reshape(ct, H, Wo).astype(mxu)
    y = jnp.einsum('oh,chw->cow', dh_ref[...], t,
                   preferred_element_type=jnp.float32)                # (Ct,Ho,Wo)
    y = y * g_ref[...].reshape(ct, 1, 1)
    o_ref[...] = y.astype(o_ref.dtype)


def _sep_slow_kernel(x_ref, g_ref, bh_ref, bwT_ref, o_ref, *, rr):
    """Slow path, separable plan: same-size lowpass with both unshuffle
    phases packed into the matrices, quadrant extraction, grouped mean."""
    gt, H, W = x_ref.shape
    mxu = bwT_ref.dtype
    Ho = bh_ref.shape[0] // 2
    Wo = bwT_ref.shape[1] // 2
    x = x_ref[...].reshape(gt * H, W).astype(mxu)
    u = jnp.dot(x, bwT_ref[...], preferred_element_type=jnp.float32)  # (Gt*H,2Wo)
    u = u.reshape(gt, H, 2 * Wo).astype(mxu)
    v = jnp.einsum('oh,chw->cow', bh_ref[...], u,
                   preferred_element_type=jnp.float32)                # (Gt,2Ho,2Wo)
    v = v * (g_ref[...].reshape(gt, 1, 1) * (1.0 / rr))
    quads = [v[:, r * Ho:(r + 1) * Ho, s * Wo:(s + 1) * Wo]
             for r in range(2) for s in range(2)]
    z = jnp.stack(quads, axis=1).reshape(gt * 4, Ho, Wo)
    out = z.reshape((gt * 4) // rr, rr, Ho, Wo).sum(axis=1)
    o_ref[...] = out.astype(o_ref.dtype)


# ---------------------------------------------------------------------------
# Module wrapper
# ---------------------------------------------------------------------------
class DownsampleLayer:
    """Pallas TPU port of the R3GAN DownsampleLayer forward pass (NCHW)."""

    _KRON_MAX_BYTES = 8 * 1024 * 1024      # max bf16 Kronecker matrix size

    def __init__(self, InputChannels, OutputChannels, ResamplingFilter,
                 mxu_dtype=jnp.bfloat16):
        self.in_ch = int(InputChannels)
        self.out_ch = int(OutputChannels)
        self.fast_path = self.in_ch == self.out_ch
        self.mxu_dtype = jnp.dtype(mxu_dtype)
        self.taps = _effective_taps(ResamplingFilter)
        self.fw = len(self.taps)
        if self.fast_path:
            self.rr = 1
        else:
            assert (self.in_ch * 4) % self.out_ch == 0, (
                "InplaceDownsampler needs OutputChannels | 4*InputChannels")
            self.rr = self.in_ch * 4 // self.out_ch
        self._plans = {}                   # (N, H, W, dtype) -> jitted fn

    def __call__(self, x, gain):
        N, C, H, W = x.shape
        assert C == self.in_ch
        assert H % 2 == 0 and W % 2 == 0, "H and W must be even"
        return self._get_plan(N, H, W, jnp.dtype(x.dtype))(x, gain)

    # -- plan construction ---------------------------------------------------
    def _get_plan(self, N, H, W, dtype):
        key = (N, H, W, dtype.name)
        plan = self._plans.get(key)
        if plan is None:
            plan = self._build_plan(N, H, W, dtype)
            self._plans[key] = plan
        return plan

    def _build_plan(self, N, H, W, dtype):
        C, C_out, rr = self.in_ch, self.out_ch, self.rr
        Ho, Wo = H // 2, W // 2
        isz = dtype.itemsize
        mxu = self.mxu_dtype
        fw, taps = self.fw, self.taps

        vmem_cap, cores = _tpu_vmem_and_cores()
        # 64 MiB parts (v7x) -> ~48 MiB scoped; 128 MiB parts -> up to 96 MiB.
        vmem_limit = int(min((vmem_cap * 3) // 4, 100 * 1024 * 1024))
        min_steps = 2 if cores >= 2 else 1
        sub = max(8, 32 // isz)            # sublane multiple for this dtype

        if self.fast_path:
            # upfirdn2d.downsample2d: down=2, pad = ((fw-1)//2, (fw-2)//2)
            pad0, pad1 = (fw - 1) // 2, (fw - 2) // 2
            Dh = _resampling_matrix(H, taps, 2, pad0, pad1)       # (Ho, H)
            Dw = _resampling_matrix(W, taps, 2, pad0, pad1)       # (Wo, W)
            group, out_num, out_den = 1, 1, 1
            qfold, nq, rsum = 4, 1, 1
        else:
            # filter2d (same size): pad = (fw//2, (fw-1)//2)
            pad0, pad1 = fw // 2, (fw - 1) // 2
            Ah = _resampling_matrix(H, taps, 1, pad0, pad1)       # (H, H)
            Aw = _resampling_matrix(W, taps, 1, pad0, pad1)       # (W, W)
            qfold = math.gcd(rr, 4)        # unshuffle phases folded into K
            nq = 4 // qfold                # remaining phase blocks in K cols
            rsum = rr // qfold             # remaining in-kernel group sum
            group = rsum                   # channel tiles align with groups
            out_num, out_den = 4, rr

        # ---- Kronecker single-matmul plan (small/medium feature maps) -----
        kron_cols = (Ho * Wo) if self.fast_path else nq * Ho * Wo
        kron_bytes = H * W * kron_cols * mxu.itemsize
        if kron_bytes <= self._KRON_MAX_BYTES:
            if self.fast_path:
                K = np.kron(Dh, Dw).T                             # (HW, HoWo)
            else:
                cols = []
                for j in range(nq):
                    acc = None
                    for q in range(j * qfold, (j + 1) * qfold):
                        r, s = q // 2, q % 2                      # unshuffle order
                        Kq = np.kron(Ah[r::2], Aw[s::2]).T        # (HW, HoWo)
                        acc = Kq if acc is None else acc + Kq
                    cols.append(acc)
                K = np.concatenate(cols, axis=1)                  # (HW, nq*HoWo)
            K_dev = jnp.asarray(np.asarray(K, np.float32), mxu)

            out_per_c = Ho * Wo if self.fast_path else (4 * Ho * Wo) // rr
            fixed = 2 * kron_bytes + 2 * 1024 * 1024
            per_c = (2 * H * W * isz           # x block (double-buffered)
                     + 2 * H * W                # bf16 copy of x tile
                     + 8 * kron_cols            # f32 matmul result (+copy)
                     + 4 * out_per_c            # f32 reduced result
                     + 2 * out_per_c * isz)     # out block (double-buffered)
            budget = vmem_limit - fixed
            ct = _pick_channel_tile(C, per_c, budget, group=group, sub_in=sub,
                                    out_num=out_num, out_den=out_den,
                                    C_out=C_out, sub_out=sub,
                                    min_steps=min_steps, n_batch=N)
            got = (ct * out_num) // out_den

            if self.fast_path:
                kernel = _kron_fast_kernel
            else:
                kernel = functools.partial(_kron_slow_kernel, nq=nq,
                                           rsum=rsum, inv_rr=1.0 / rr)

            call = pl.pallas_call(
                kernel,
                out_shape=jax.ShapeDtypeStruct((N, C_out, Ho * Wo), dtype),
                grid=(N, C // ct),
                in_specs=[
                    pl.BlockSpec((None, ct, H * W), lambda n, t: (n, t, 0)),
                    pl.BlockSpec((ct, 1), lambda n, t: (t, 0)),      # gain
                    pl.BlockSpec((H * W, kron_cols), lambda n, t: (0, 0)),
                ],
                out_specs=pl.BlockSpec((None, got, Ho * Wo),
                                       lambda n, t: (n, t, 0)),
                compiler_params=pltpu.CompilerParams(
                    dimension_semantics=("parallel", "parallel"),
                    vmem_limit_bytes=vmem_limit),
            )

            @jax.jit
            def fn(x, gain):
                g = gain.reshape(-1, 1).astype(jnp.float32)
                xf = x.reshape(N, C, H * W)       # lane-dense flattened spatial
                y = call(xf, g, K_dev)
                return y.reshape(N, C_out, Ho, Wo)
            return fn

        # ---- Separable two-matmul plan (large feature maps) ----------------
        # TODO(synk): for very large W (>= ~512, v5e first) replace the dense
        # Dw/Dh matrices with a banded / shifted-add formulation; the dense
        # form does O(W/4) extra MXU work per output element.
        if self.fast_path:
            L = np.asarray(Dh, np.float32)                        # (Ho, H)
            RT = np.asarray(Dw.T, np.float32)                     # (W, Wo)
        else:
            Bh = np.concatenate([Ah[0::2], Ah[1::2]], axis=0)     # (2Ho, H)
            BwT = np.concatenate([Aw[0::2].T, Aw[1::2].T], axis=1)  # (W, 2Wo)
            L = np.asarray(Bh, np.float32)
            RT = np.asarray(BwT, np.float32)
        L_dev = jnp.asarray(L, mxu)
        RT_dev = jnp.asarray(RT, mxu)

        out_per_c = Ho * Wo if self.fast_path else (4 * Ho * Wo) // rr
        wo_cols = RT.shape[1]                                     # Wo or 2Wo
        fixed = 2 * (L.size + RT.size) * mxu.itemsize + 2 * 1024 * 1024
        per_c = (2 * H * W * isz + 2 * H * W          # x block + bf16 copy
                 + H * wo_cols * 6                    # intermediate f32+bf16
                 + (8 if self.fast_path else 20) * Ho * Wo   # v / quads (f32)
                 + 2 * out_per_c * isz)               # out block
        budget = vmem_limit - fixed
        ct = _pick_channel_tile(C, per_c, budget, group=group, sub_in=8,
                                out_num=out_num, out_den=out_den,
                                C_out=C_out, sub_out=8,
                                min_steps=min_steps, n_batch=N)
        got = (ct * out_num) // out_den

        if self.fast_path:
            kernel = _sep_fast_kernel
        else:
            kernel = functools.partial(_sep_slow_kernel, rr=rr)

        call = pl.pallas_call(
            kernel,
            out_shape=jax.ShapeDtypeStruct((N, C_out, Ho, Wo), dtype),
            grid=(N, C // ct),
            in_specs=[
                pl.BlockSpec((None, ct, H, W), lambda n, t: (n, t, 0, 0)),
                pl.BlockSpec((ct, 1), lambda n, t: (t, 0)),          # gain
                pl.BlockSpec(L.shape, lambda n, t: (0, 0)),
                pl.BlockSpec(RT.shape, lambda n, t: (0, 0)),
            ],
            out_specs=pl.BlockSpec((None, got, Ho, Wo),
                                   lambda n, t: (n, t, 0, 0)),
            compiler_params=pltpu.CompilerParams(
                dimension_semantics=("parallel", "parallel"),
                vmem_limit_bytes=vmem_limit),
        )

        @jax.jit
        def fn(x, gain):
            g = gain.reshape(-1, 1).astype(jnp.float32)
            return call(x, g, L_dev, RT_dev)
        return fn


# ---------------------------------------------------------------------------
# Pure-JAX f32 reference (mirrors the PyTorch / upfirdn2d semantics)
# ---------------------------------------------------------------------------
def _reference(x, gain, resampling_filter, out_channels):
    f = jnp.asarray(resampling_filter, jnp.float32)
    f2 = jnp.outer(f, f)
    f2 = f2 / jnp.sum(f2)
    keff = f2[::-1, ::-1]
    fw = f2.shape[0]
    N, C, H, W = x.shape
    xg = x * gain.reshape(1, -1, 1, 1).astype(x.dtype)
    Ho, Wo = H // 2, W // 2
    if C == out_channels:
        pad0, pad1 = (fw - 1) // 2, (fw - 2) // 2
        xp = jnp.pad(xg, ((0, 0), (0, 0), (pad0, pad1), (pad0, pad1)))
        out = jnp.zeros((N, C, Ho, Wo), x.dtype)
        for a in range(fw):
            for b in range(fw):
                out = out + keff[a, b] * xp[:, :, a:a + 2 * Ho:2,
                                            b:b + 2 * Wo:2]
        return out
    pad0, pad1 = fw // 2, (fw - 1) // 2
    xp = jnp.pad(xg, ((0, 0), (0, 0), (pad0, pad1), (pad0, pad1)))
    y = jnp.zeros((N, C, H, W), x.dtype)
    for a in range(fw):
        for b in range(fw):
            y = y + keff[a, b] * xp[:, :, a:a + H, b:b + W]
    z = y.reshape(N, C, Ho, 2, Wo, 2).transpose(0, 1, 3, 5, 2, 4)
    z = z.reshape(N, C * 4, Ho, Wo)
    rr = C * 4 // out_channels
    return z.reshape(N, out_channels, rr, Ho, Wo).mean(axis=2)


if __name__ == "__main__":
    key = jax.random.PRNGKey(0)
    k1, k2, k3 = jax.random.split(key, 3)
    N, C_in, H, W = 2, 4, 16, 16
    resampling_filter = [1, 3, 3, 1]

    x = jax.random.normal(k1, (N, C_in, H, W), jnp.float32)
    gain_a = jax.random.normal(k2, (C_in,), jnp.float32)
    gain_b = jax.random.normal(k3, (C_in,), jnp.float32)

    # bf16 MXU operands (taps exact in bf16), f32 accumulation + f32 gain.
    TOL = dict(rtol=2e-2, atol=2e-2)

    # Fast path (InterpolativeDownsampler): InputChannels == OutputChannels
    layer_fast = DownsampleLayer(C_in, C_in, resampling_filter)
    out_fast = jax.block_until_ready(layer_fast(x, gain_a))
    ref_fast = _reference(x, gain_a, resampling_filter, C_in)
    np.testing.assert_allclose(np.asarray(out_fast), np.asarray(ref_fast),
                               **TOL)

    # Slow path (InplaceDownsampler), ReductionRate = 2 (groups within channel)
    layer_s2 = DownsampleLayer(C_in, 8, resampling_filter)
    out_s2 = jax.block_until_ready(layer_s2(x, gain_b))
    ref_s2 = _reference(x, gain_b, resampling_filter, 8)
    np.testing.assert_allclose(np.asarray(out_s2), np.asarray(ref_s2), **TOL)

    # Slow path, ReductionRate = 8 (groups span two input channels)
    layer_s8 = DownsampleLayer(C_in, 2, resampling_filter)
    out_s8 = jax.block_until_ready(layer_s8(x, gain_b))
    ref_s8 = _reference(x, gain_b, resampling_filter, 2)
    np.testing.assert_allclose(np.asarray(out_s8), np.asarray(ref_s8), **TOL)

    print("KERNEL_OK")
</pallas_src>

<mosaic_0001>
module attributes {stable_mosaic.version = 11 : i64} {
  func.func @_kron_fast_kernel(%arg0: i32, %arg1: i32, %arg2: memref<1x4x256xf32, #tpu.memory_space<vmem>>, %arg3: memref<4x1xf32, #tpu.memory_space<vmem>>, %arg4: memref<256x64xbf16, #tpu.memory_space<vmem>>, %arg5: memref<1x4x64xf32, #tpu.memory_space<vmem>>) attributes {dimension_semantics = [#tpu.dimension_semantics<parallel>, #tpu.dimension_semantics<parallel>], iteration_bounds = array<i64: 2, 1>, scalar_prefetch = 0 : i64, scratch_operands = 0 : i64, tpu.core_type = #tpu.core_type<tc>, window_params = [{transform_indices = @transform_0, window_bounds = array<i64: 1, 4, 256>}, {transform_indices = @transform_1, window_bounds = array<i64: 4, 1>}, {pipeline_mode = #tpu.pipeline_mode<synchronous>, transform_indices = @transform_2, window_bounds = array<i64: 256, 64>}, {transform_indices = @transform_3, window_bounds = array<i64: 1, 4, 64>}]} {
    %c0 = arith.constant 0 : index
    %c0_0 = arith.constant 0 : index
    %c0_1 = arith.constant 0 : index
    %0 = vector.load %arg2[%c0, %c0_0, %c0_1] : memref<1x4x256xf32, #tpu.memory_space<vmem>>, vector<1x4x256xf32>
    %1 = vector.shape_cast %0 : vector<1x4x256xf32> to vector<4x256xf32>
    %2 = arith.truncf %1 : vector<4x256xf32> to vector<4x256xbf16>
    %c0_2 = arith.constant 0 : index
    %c0_3 = arith.constant 0 : index
    %3 = vector.load %arg4[%c0_2, %c0_3] : memref<256x64xbf16, #tpu.memory_space<vmem>>, vector<256x64xbf16>
    %cst = arith.constant dense<0.000000e+00> : vector<4x64xf32>
    %4 = tpu.matmul %2, %3, %cst {dimension_numbers = #tpu.dot_dimension_numbers<[1], [0], [0], [1], [0, 0, 1, 1], [], []>} : vector<4x256xbf16>, vector<256x64xbf16>, vector<4x64xf32> -> vector<4x64xf32>
    %c0_4 = arith.constant 0 : index
    %c0_5 = arith.constant 0 : index
    %5 = vector.load %arg3[%c0_4, %c0_5] : memref<4x1xf32, #tpu.memory_space<vmem>>, vector<4x1xf32>
    %6 = vector.broadcast %5 : vector<4x1xf32> to vector<4x64xf32>
    %7 = arith.mulf %4, %6 : vector<4x64xf32>
    %c0_6 = arith.constant 0 : index
    %c0_7 = arith.constant 0 : index
    %c0_8 = arith.constant 0 : index
    %8 = vector.load %arg5[%c0_6, %c0_7, %c0_8] : memref<1x4x64xf32, #tpu.memory_space<vmem>>, vector<1x4x64xf32>
    %9 = vector.shape_cast %8 : vector<1x4x64xf32> to vector<4x64xf32>
    %10 = vector.shape_cast %7 : vector<4x64xf32> to vector<1x4x64xf32>
    tpu.vector_store %arg5[%c0_6, %c0_7, %c0_8], %10 {strides = array<i32>} : memref<1x4x64xf32, #tpu.memory_space<vmem>>, vector<1x4x64xf32>,
    return
  }
  func.func @transform_0(%arg0: i32, %arg1: i32) -> (i32, i32, i32) {
    %c0_i32 = arith.constant 0 : i32
    %c0_i32_0 = arith.constant 0 : i32
    return %arg0, %arg1, %c0_i32 : i32, i32, i32
  }
  func.func @transform_1(%arg0: i32, %arg1: i32) -> (i32, i32) {
    %c0_i32 = arith.constant 0 : i32
    %c0_i32_0 = arith.constant 0 : i32
    return %arg1, %c0_i32 : i32, i32
  }
  func.func @transform_2(%arg0: i32, %arg1: i32) -> (i32, i32) {
    %c0_i32 = arith.constant 0 : i32
    %c0_i32_0 = arith.constant 0 : i32
    %c0_i32_1 = arith.constant 0 : i32
    return %c0_i32, %c0_i32_0 : i32, i32
  }
  func.func @transform_3(%arg0: i32, %arg1: i32) -> (i32, i32, i32) {
    %c0_i32 = arith.constant 0 : i32
    %c0_i32_0 = arith.constant 0 : i32
    return %arg0, %arg1, %c0_i32 : i32, i32, i32
  }
}

</mosaic_0001>

<bundles_post_ra>
// kernel: fn.1
= control target key start
LH: loop header
LB: loop body
LE: loop exit
PB: predicated region body
PF: predicated region fallthrough
CT: control target
= control target key end

     0   :  { %s638_s12 = smov 0   ;;  %s640_s13 = smov 0   ;;  %s726_s0 = inlined_call_operand.vmem [shape: f32[2,4,256], index: 0, kind: input, shape index: {}]   ;;  %s727_s1 = inlined_call_operand.vmem [shape: f32[4,1], index: 1, kind: input, shape index: {}]   ;;  %s728_s2 = inlined_call_operand.vmem [shape: bf16[256,64], index: 2, kind: input, shape index: {}]   ;;  %s729_s3 = inlined_call_operand.vmem [shape: f32[2,4,64], index: 3, kind: output, shape index: {}]  }
   0x1   :  { %s642_s14 = smov 0  }
   0x2 LB: > { %s25_s15 = sadd.s32 1, %s611_s13  ;;  %p505_p0 = scmp.ge.s32.totalorder %s615_s14, 1  ;;  %s615_s14 = sphi %s642_s14, %s13_s14   ;;  %s611_s13 = sphi %s640_s13, %s731_s13   ;;  %s607_s12 = sphi %s638_s12, %s730_s12  }
   0x3   : > { %p27_p1 = scmp.ge.s32.totalorder %s25_s15, 2  ;;  %p166_p2 = scmp.lt.s32.totalorder %s615_s14, 3 }
   0x5   : > { %s733_s15 = smov (%p27_p1, %s25_s15), 0  ;;  %p167_p3 = pnand %p505_p0, %p166_p2 }
   0x6   : > { %v576_v0 = vld [vmem:[%s728_s2 + $0x40] sm:$0xff] (!%p167_p3)   ;;  %v578_v2 = vld [vmem:[%s728_s2 + $0x48] sm:$0xff] (!%p167_p3)   ;;  %p200_p4 = scmp.lt.s32.totalorder (!%p167_p3), %s607_s12, 1  ;;  %v617_v3 = vmov (!%p167_p3), 0   ;;  %v580_v5 = vld [vmem:[%s728_s2 + $0x50] sm:$0xff] (!%p167_p3)   ;;  %vm402_vm0 = vcmask (!%p167_p3), 519168  }
   0x7   : > { %170 = sbr.rel (%p167_p3) target bundleno = 257 (0x101), region = 32  ;;  %v577_v1 = vld [vmem:[%s728_s2] sm:$0xff] (!%p167_p3)   ;;  %528 = vmatprep.subr.bf16.mxu0 (!%p167_p3), %v576_v0  ;;  %575 = vset.pattern.permute.xlu0 (!%p167_p3), %v617_v3  ;;  %v579_v4 = vld [vmem:[%s728_s2 + $0x8] sm:$0xff] (!%p167_p3)   ;;  %v581_v6 = vld [vmem:[%s728_s2 + $0x10] sm:$0xff] (!%p167_p3)  }
   0x8   : > { %529 = vmatpush3.bf16.msra.mxu0 (!%p167_p3), %v577_v1  ;;  %v582_v7 = vld [vmem:[%s728_s2 + $0x58] sm:$0xff] (!%p167_p3)   ;;  %v584_v9 = vld [vmem:[%s728_s2 + $0x60] sm:$0xff] (!%p167_p3)   ;;  %v586_v11 = vld [vmem:[%s728_s2 + $0x68] sm:$0xff] (!%p167_p3)  }
   0x9   : > { %530 = vmatprep.subr.bf16.mxu0 (!%p167_p3), %v578_v2  ;;  %v583_v8 = vld [vmem:[%s728_s2 + $0x18] sm:$0xff] (!%p167_p3)   ;;  %v585_v10 = vld [vmem:[%s728_s2 + $0x20] sm:$0xff] (!%p167_p3)   ;;  %v587_v15 = vld [vmem:[%s728_s2 + $0x28] sm:$0xff] (!%p167_p3)  }
   0xa   : > { %v395_v13 = vld [vmem:[%s727_s1] sm:$0xf] (!%p167_p3)  ;;  %v588_v17 = vld [vmem:[%s728_s2 + $0x70] sm:$0xff] (!%p167_p3)   ;;  %v590_v19 = vld [vmem:[%s728_s2 + $0x78] sm:$0xff] (!%p167_p3)  }
   0xb   : > { %398 = vperm.xlu0 (!%p167_p3), %575, %v395_v13   ;;  %v589_v18 = vld [vmem:[%s728_s2 + $0x30] sm:$0xff] (!%p167_p3)   ;;  %v591_v20 = vld [vmem:[%s728_s2 + $0x38] sm:$0xff] (!%p167_p3)  }
   0xc   : > { %531 = vmatpush3.bf16.msra.mxu0 (!%p167_p3), %v579_v4 }
   0xd   : > { %532 = vmatprep.subr.bf16.mxu0 (!%p167_p3), %v580_v5 }
   0xe   : > { %s735_s12 = smov (!%p200_p4, %s607_s12), 1 }
   0xf   : > { %s527_s30 = sshll.u32 %s735_s12, 3  ;;  %s508_s4 = sshll.u32 %s735_s12, 2 }
  0x10   : > { %533 = vmatpush3.bf16.msra.mxu0 %v581_v6  ;;  %s208_s10 = scalar_lea.vmem %s726_s0, %s527_s30  ;;  %s219_s7 = scalar_lea.vmem %s729_s3, %s508_s4 }
  0x11   : > { %534 = vmatprep.subr.bf16.mxu0 %v582_v7  ;;  %v221_v12 = vld [vmem:[%s208_s10] sm:$0xff] }
  0x12   : > { %v223_v14 = vcombine.high %v221_v12, %v221_v12  ;;  %v225_v21 = vpack.c.bf16 %v221_v12, %v221_v12 }
  0x14   : > { %535 = vmatpush3.bf16.msra.mxu0 %v583_v8  ;;  %v226_v16 = vpack.c.bf16 %v223_v14, %v223_v14 }
  0x15   : > { %536 = vmatprep.subr.bf16.mxu0 %v584_v9 }
  0x16   : > { %387 = vmatprep.mubr.bf16.mxu0 %v226_v16 }
  0x18   : > { %537 = vmatpush3.bf16.msra.mxu0 %v585_v10 }
  0x19   : > { %538 = vmatprep.subr.bf16.mxu0 %v586_v11 }
  0x1c   : > { %539 = vmatpush3.bf16.msra.mxu0 %v587_v15 }
  0x1d   : > { %540 = vmatprep.subr.bf16.mxu0 %v588_v17 }
  0x20   : > { %541 = vmatpush3.bf16.msra.mxu0 %v589_v18 }
  0x21   : > { %542 = vmatprep.subr.bf16.mxu0 %v590_v19 }
  0x24   : > { %543 = vmatpush3.bf16.msra.mxu0 %v591_v20 }
  0x27   : > { %388 = vmatmul.mubr.bf16.vlgmr.msra.gmra.mrb[0].mxu0 %v225_v21 }
  0x8a   : > { %v399_v24 = vpop.permute.xlu0 %398 }
  0xfa   : > { %v544_v22 = vpop.f32.mrb[0].mxu0 }
  0xfb   : > { %v545_v23 = vpop.f32.mrb[1].mxu0 }
  0xfc   : > { %v546_v25 = vadd.f32 %v545_v23, %v544_v22  ;;  %v547_v26 = vpop.f32.mrb[2].mxu0 }
  0xfd   : > { %v548_v27 = vpop.f32.mrb[3].mxu0 }
  0xfe   : > { %v401_v28 = vmul.f32 %v546_v25, %v399_v24 }
 0x100   : > { %403 = vst.msk [vmem:[%s219_s7] sm:$0xf] %vm402_vm0, %v401_v28 }
 0x101 PF: > { %s13_s14 = sadd.s32 1, %s615_s14   ;;  %s730_s12 = smov %s611_s13 }
 0x102   : > { %p10_p5 = scmp.ge.s32.totalorder %s13_s14, 4   ;;  %s731_s13 = smov %s733_s15 }
 0x104   :  { %12 = sbr.rel (!%p10_p5) target bundleno = 2 (0x2), region = 65 }

</bundles_post_ra>
